<compile_context>
chip_gen: v6e
topology: v6e:2x2x1
jax: 0.10.0
libtpu: 0.0.40
codegen_flags: <defaults>
</compile_context>

<pallas_src>
import functools

import jax
import jax.numpy as jnp
import numpy as np
from jax.experimental import pallas as pl
from jax.experimental.pallas import tpu as pltpu

LANES = 128  # packed lane width for weights / activations


def _round_up(x, m):
    return (x + m - 1) // m * m


def _net_kernel(x_ref, w_ref, b_ref, out_ref, *, state_dim, out_cols):
    """Fused actor-critic forward on one batch tile.

    x_ref   : (TB, state_dim) f32   input states
    w_ref   : (3, LANES, LANES) bf16 packed weights:
                [0, :state_dim, :hidden]            = fc1
                [1, :hidden, :hidden]               = mean1
                [1, :hidden, hidden:2*hidden]       = v2
                [2, :hidden, :action_dim]           = mean2
                [2, hidden:2*hidden, action_dim]    = v3      (everything else 0)
    b_ref   : (8, LANES) f32  row0 fc1 bias, row1 mean1|v2 bias, row2 mean2|v3
              bias, row3 tanh-mask (1 on mean half), row4 relu-mask (1 elsewhere)
    out_ref : (TB, out_cols) f32  cols [0, action_dim) = action means,
              col action_dim = value (remaining cols are exact zeros)
    """
    x = x_ref[...].astype(jnp.bfloat16)

    w1 = w_ref[0, :state_dim, :]          # (state_dim, LANES) bf16
    w_branch = w_ref[1]                   # (LANES, LANES)     bf16
    w_out = w_ref[2]                      # (LANES, LANES)     bf16

    b1 = b_ref[0:1, :]                    # (1, LANES) f32
    b_branch = b_ref[1:2, :]
    b_out = b_ref[2:3, :out_cols]
    tanh_mask = b_ref[3:4, :]             # 1.0 on the mean half, else 0
    relu_mask = b_ref[4:5, :]             # 1.0 on the value half + padding

    # fc1 + relu.  Padded columns (>= hidden) stay exactly 0 (zero W, zero b).
    y1 = jnp.maximum(
        jnp.dot(x, w1, preferred_element_type=jnp.float32) + b1, 0.0)

    # mean1 and v2 fused into a single MXU call:
    #   cols [0, hidden) = mean1(y1), cols [hidden, 2*hidden) = v2(y1), rest 0.
    h = jnp.dot(y1.astype(jnp.bfloat16), w_branch,
                preferred_element_type=jnp.float32) + b_branch
    # tanh on the mean half, relu on the value half (relu(0)=0 keeps padding 0).
    act = tanh_mask * jnp.tanh(h) + relu_mask * jnp.maximum(h, 0.0)

    # mean2 and v3 fused via block-diagonal weights; store only the useful
    # (narrow) column slab -> ~16x less output HBM writeback than a 128-wide slab.
    out = jnp.dot(act.astype(jnp.bfloat16), w_out,
                  preferred_element_type=jnp.float32)
    out_ref[...] = (out[:, :out_cols] + b_out).astype(out_ref.dtype)


def pack_params(p):
    """Pack per-layer weights/biases into the kernel's fused bf16/f32 layout."""
    state_dim, hidden = p["w1"].shape
    action_dim = p["wm2"].shape[1]
    out_cols = _round_up(action_dim + 1, 8)
    assert state_dim <= LANES and 2 * hidden <= LANES and out_cols <= LANES

    w = np.zeros((3, LANES, LANES), np.float32)
    w[0, :state_dim, :hidden] = np.asarray(p["w1"])
    w[1, :hidden, :hidden] = np.asarray(p["wm1"])
    w[1, :hidden, hidden:2 * hidden] = np.asarray(p["wv2"])
    w[2, :hidden, :action_dim] = np.asarray(p["wm2"])
    w[2, hidden:2 * hidden, action_dim] = np.asarray(p["wv3"])[:, 0]

    b = np.zeros((8, LANES), np.float32)
    b[0, :hidden] = np.asarray(p["b1"])[0]
    b[1, :hidden] = np.asarray(p["bm1"])[0]
    b[1, hidden:2 * hidden] = np.asarray(p["bv2"])[0]
    b[2, :action_dim] = np.asarray(p["bm2"])[0]
    b[2, action_dim] = np.asarray(p["bv3"])[0, 0]
    b[3, :hidden] = 1.0          # tanh-mask: mean half
    b[4, hidden:] = 1.0          # relu-mask: value half + zero padding

    return dict(w=jnp.asarray(w, dtype=jnp.bfloat16),   # 96 KiB resident
                b=jnp.asarray(b),                       # f32 biases + masks
                state_dim=state_dim, hidden=hidden,
                action_dim=action_dim, out_cols=out_cols)


def net_forward(states, packed, *, block_rows=2048):
    """states: (B, state_dim) f32.  packed: output of pack_params."""
    B, state_dim = states.shape
    assert state_dim == packed["state_dim"]
    action_dim = packed["action_dim"]
    out_cols = packed["out_cols"]

    # Batch tile: as large as possible (fewer grid steps), but sized at
    # ceil(B/2) so the grid keeps >=2 steps when B allows -> v7x megacore gets
    # work on both TensorCores; the extra step is noise on single-TC v5e/v6e.
    half = -(-B // 2)
    tb = max(8, min(block_rows, _round_up(half, 8)))
    grid = (pl.cdiv(B, tb),)   # ragged last block: padded reads, masked writes

    kernel = functools.partial(_net_kernel, state_dim=state_dim, out_cols=out_cols)

    out = pl.pallas_call(
        kernel,
        out_shape=jax.ShapeDtypeStruct((B, out_cols), jnp.float32),
        grid_spec=pltpu.PrefetchScalarGridSpec(
            num_scalar_prefetch=0,
            grid=grid,
            in_specs=[
                pl.BlockSpec((tb, state_dim), lambda i: (i, 0)),
                pl.BlockSpec((3, LANES, LANES), lambda i: (0, 0, 0)),  # resident weights
                pl.BlockSpec((8, LANES), lambda i: (0, 0)),            # resident biases/masks
            ],
            out_specs=pl.BlockSpec((tb, out_cols), lambda i: (i, 0)),
        ),
        compiler_params=pltpu.CompilerParams(
            dimension_semantics=("parallel",),      # batch axis across TCs (v7x)
            vmem_limit_bytes=32 * 1024 * 1024,      # lift v5e's 16 MiB scoped default
        ),
    )(states, packed["w"], packed["b"])

    # Narrow (B, out_cols) slab -> these slices touch only 32 B/row.
    action_means = out[:, :action_dim]
    value = out[:, action_dim:action_dim + 1]
    return action_means, value


def init_params(key, state_dim, action_dim, hidden_size=32):
    """Deterministic PyTorch-Linear-style init (uniform(-1/sqrt(fan_in), +))."""
    def linear(key, fan_in, fan_out):
        kw, kb = jax.random.split(key)
        bound = 1.0 / np.sqrt(fan_in)
        w = jax.random.uniform(kw, (fan_in, fan_out), jnp.float32, -bound, bound)
        b = jax.random.uniform(kb, (1, fan_out), jnp.float32, -bound, bound)
        return w, b

    k1, k2, k3, k4, k5 = jax.random.split(key, 5)
    w1, b1 = linear(k1, state_dim, hidden_size)
    wm1, bm1 = linear(k2, hidden_size, hidden_size)
    wm2, bm2 = linear(k3, hidden_size, action_dim)
    wv2, bv2 = linear(k4, hidden_size, hidden_size)
    wv3, bv3 = linear(k5, hidden_size, 1)
    return dict(w1=w1, b1=b1, wm1=wm1, bm1=bm1, wm2=wm2, bm2=bm2,
                wv2=wv2, bv2=bv2, wv3=wv3, bv3=bv3)


def net_forward_ref(states, p):
    """Plain-JAX f32 reference mirroring the PyTorch forward."""
    y1 = jax.nn.relu(states @ p["w1"] + p["b1"])
    mean = jnp.tanh(y1 @ p["wm1"] + p["bm1"])
    action_means = mean @ p["wm2"] + p["bm2"]
    value = jax.nn.relu(y1 @ p["wv2"] + p["bv2"])
    value = value @ p["wv3"] + p["bv3"]
    return action_means, value


if __name__ == "__main__":
    state_dim, action_dim, hidden_size = 16, 4, 32
    batch = 8

    key = jax.random.PRNGKey(0)
    k_params, k_states = jax.random.split(key)
    params = init_params(k_params, state_dim, action_dim, hidden_size)
    packed = pack_params(params)
    states = jax.random.normal(k_states, (batch, state_dim), jnp.float32)

    # Tolerance accounts for bf16 weights/activations (f32 accumulation).
    RTOL = ATOL = 2e-2

    # small (rollout-sized) call — still exercises the kernel path
    action_means, value = net_forward(states, packed)
    jax.block_until_ready((action_means, value))

    ref_means, ref_value = net_forward_ref(states, params)
    np.testing.assert_allclose(np.asarray(action_means), np.asarray(ref_means),
                               rtol=RTOL, atol=ATOL)
    np.testing.assert_allclose(np.asarray(value), np.asarray(ref_value),
                               rtol=RTOL, atol=ATOL)
    assert action_means.shape == (batch, action_dim)
    assert value.shape == (batch, 1)

    # batched (PPO-update-sized) call: 2 grid steps + ragged last block (no host pad)
    big_states = jax.random.normal(jax.random.PRNGKey(1), (1061, state_dim), jnp.float32)
    big_means, big_value = net_forward(big_states, packed)
    jax.block_until_ready((big_means, big_value))
    ref_bm, ref_bv = net_forward_ref(big_states, params)
    np.testing.assert_allclose(np.asarray(big_means), np.asarray(ref_bm),
                               rtol=RTOL, atol=ATOL)
    np.testing.assert_allclose(np.asarray(big_value), np.asarray(ref_bv),
                               rtol=RTOL, atol=ATOL)
    assert big_means.shape == (1061, action_dim)
    assert big_value.shape == (1061, 1)

    print("KERNEL_OK")
</pallas_src>

<mosaic_0001>
module attributes {stable_mosaic.version = 11 : i64} {
  func.func @_net_kernel(%arg0: i32, %arg1: memref<8x16xf32, #tpu.memory_space<vmem>>, %arg2: memref<3x128x128xbf16, #tpu.memory_space<vmem>>, %arg3: memref<8x128xf32, #tpu.memory_space<vmem>>, %arg4: memref<8x8xf32, #tpu.memory_space<vmem>>) attributes {dimension_semantics = [#tpu.dimension_semantics<parallel>], iteration_bounds = array<i64: 1>, scalar_prefetch = 0 : i64, scratch_operands = 0 : i64, tpu.core_type = #tpu.core_type<tc>, window_params = [{transform_indices = @transform_0, window_bounds = array<i64: 8, 16>}, {pipeline_mode = #tpu.pipeline_mode<synchronous>, transform_indices = @transform_1, window_bounds = array<i64: 3, 128, 128>}, {pipeline_mode = #tpu.pipeline_mode<synchronous>, transform_indices = @transform_2, window_bounds = array<i64: 8, 128>}, {transform_indices = @transform_3, window_bounds = array<i64: 8, 8>}]} {
    %c0 = arith.constant 0 : index
    %c0_0 = arith.constant 0 : index
    %0 = vector.load %arg1[%c0, %c0_0] : memref<8x16xf32, #tpu.memory_space<vmem>>, vector<8x16xf32>
    %1 = arith.truncf %0 : vector<8x16xf32> to vector<8x16xbf16>
    %c0_1 = arith.constant 0 : index
    %c0_2 = arith.constant 0 : index
    %c0_3 = arith.constant 0 : index
    %2 = vector.load %arg2[%c0_1, %c0_2, %c0_3] : memref<3x128x128xbf16, #tpu.memory_space<vmem>>, vector<1x16x128xbf16>
    %3 = vector.shape_cast %2 : vector<1x16x128xbf16> to vector<16x128xbf16>
    %c1 = arith.constant 1 : index
    %c0_4 = arith.constant 0 : index
    %c0_5 = arith.constant 0 : index
    %4 = vector.load %arg2[%c1, %c0_4, %c0_5] : memref<3x128x128xbf16, #tpu.memory_space<vmem>>, vector<1x128x128xbf16>
    %5 = vector.shape_cast %4 : vector<1x128x128xbf16> to vector<128x128xbf16>
    %c2 = arith.constant 2 : index
    %c0_6 = arith.constant 0 : index
    %c0_7 = arith.constant 0 : index
    %6 = vector.load %arg2[%c2, %c0_6, %c0_7] : memref<3x128x128xbf16, #tpu.memory_space<vmem>>, vector<1x128x128xbf16>
    %7 = vector.shape_cast %6 : vector<1x128x128xbf16> to vector<128x128xbf16>
    %c0_8 = arith.constant 0 : index
    %c0_9 = arith.constant 0 : index
    %8 = vector.load %arg3[%c0_8, %c0_9] : memref<8x128xf32, #tpu.memory_space<vmem>>, vector<1x128xf32>
    %c1_10 = arith.constant 1 : index
    %c0_11 = arith.constant 0 : index
    %9 = vector.load %arg3[%c1_10, %c0_11] : memref<8x128xf32, #tpu.memory_space<vmem>>, vector<1x128xf32>
    %c2_12 = arith.constant 2 : index
    %c0_13 = arith.constant 0 : index
    %10 = vector.load %arg3[%c2_12, %c0_13] : memref<8x128xf32, #tpu.memory_space<vmem>>, vector<1x8xf32>
    %c3 = arith.constant 3 : index
    %c0_14 = arith.constant 0 : index
    %11 = vector.load %arg3[%c3, %c0_14] : memref<8x128xf32, #tpu.memory_space<vmem>>, vector<1x128xf32>
    %c4 = arith.constant 4 : index
    %c0_15 = arith.constant 0 : index
    %12 = vector.load %arg3[%c4, %c0_15] : memref<8x128xf32, #tpu.memory_space<vmem>>, vector<1x128xf32>
    %cst = arith.constant dense<0.000000e+00> : vector<8x128xf32>
    %13 = tpu.matmul %1, %3, %cst {dimension_numbers = #tpu.dot_dimension_numbers<[1], [0], [0], [1], [0, 0, 1, 1], [], []>} : vector<8x16xbf16>, vector<16x128xbf16>, vector<8x128xf32> -> vector<8x128xf32>
    %14 = vector.broadcast %8 : vector<1x128xf32> to vector<8x128xf32>
    %15 = arith.addf %13, %14 : vector<8x128xf32>
    %cst_16 = arith.constant 0.000000e+00 : f32
    %16 = vector.broadcast %cst_16 : f32 to vector<8x128xf32>
    %17 = arith.maximumf %15, %16 : vector<8x128xf32>
    %18 = arith.truncf %17 : vector<8x128xf32> to vector<8x128xbf16>
    %cst_17 = arith.constant dense<0.000000e+00> : vector<8x128xf32>
    %19 = tpu.matmul %18, %5, %cst_17 {dimension_numbers = #tpu.dot_dimension_numbers<[1], [0], [0], [1], [0, 0, 1, 1], [], []>} : vector<8x128xbf16>, vector<128x128xbf16>, vector<8x128xf32> -> vector<8x128xf32>
    %20 = vector.broadcast %9 : vector<1x128xf32> to vector<8x128xf32>
    %21 = arith.addf %19, %20 : vector<8x128xf32>
    %22 = math.tanh %21 : vector<8x128xf32>
    %23 = vector.broadcast %11 : vector<1x128xf32> to vector<8x128xf32>
    %24 = arith.mulf %23, %22 : vector<8x128xf32>
    %cst_18 = arith.constant 0.000000e+00 : f32
    %25 = vector.broadcast %cst_18 : f32 to vector<8x128xf32>
    %26 = arith.maximumf %21, %25 : vector<8x128xf32>
    %27 = vector.broadcast %12 : vector<1x128xf32> to vector<8x128xf32>
    %28 = arith.mulf %27, %26 : vector<8x128xf32>
    %29 = arith.addf %24, %28 : vector<8x128xf32>
    %30 = arith.truncf %29 : vector<8x128xf32> to vector<8x128xbf16>
    %cst_19 = arith.constant dense<0.000000e+00> : vector<8x128xf32>
    %31 = tpu.matmul %30, %7, %cst_19 {dimension_numbers = #tpu.dot_dimension_numbers<[1], [0], [0], [1], [0, 0, 1, 1], [], []>} : vector<8x128xbf16>, vector<128x128xbf16>, vector<8x128xf32> -> vector<8x128xf32>
    %32 = vector.extract_strided_slice %31 {offsets = [0, 0], sizes = [8, 8], strides = [1, 1]} : vector<8x128xf32> to vector<8x8xf32>
    %33 = vector.broadcast %10 : vector<1x8xf32> to vector<8x8xf32>
    %34 = arith.addf %32, %33 : vector<8x8xf32>
    %c0_20 = arith.constant 0 : index
    %c0_21 = arith.constant 0 : index
    %35 = vector.load %arg4[%c0_20, %c0_21] : memref<8x8xf32, #tpu.memory_space<vmem>>, vector<8x8xf32>
    tpu.vector_store %arg4[%c0_20, %c0_21], %34 {strides = array<i32>} : memref<8x8xf32, #tpu.memory_space<vmem>>, vector<8x8xf32>,
    return
  }
  func.func @transform_0(%arg0: i32) -> (i32, i32) {
    %c0_i32 = arith.constant 0 : i32
    %c0_i32_0 = arith.constant 0 : i32
    return %arg0, %c0_i32 : i32, i32
  }
  func.func @transform_1(%arg0: i32) -> (i32, i32, i32) {
    %c0_i32 = arith.constant 0 : i32
    %c0_i32_0 = arith.constant 0 : i32
    %c0_i32_1 = arith.constant 0 : i32
    %c0_i32_2 = arith.constant 0 : i32
    return %c0_i32, %c0_i32_0, %c0_i32_1 : i32, i32, i32
  }
  func.func @transform_2(%arg0: i32) -> (i32, i32) {
    %c0_i32 = arith.constant 0 : i32
    %c0_i32_0 = arith.constant 0 : i32
    %c0_i32_1 = arith.constant 0 : i32
    return %c0_i32, %c0_i32_0 : i32, i32
  }
  func.func @transform_3(%arg0: i32) -> (i32, i32) {
    %c0_i32 = arith.constant 0 : i32
    %c0_i32_0 = arith.constant 0 : i32
    return %arg0, %c0_i32 : i32, i32
  }
}

</mosaic_0001>

<bundles_post_ra>
// kernel: tpu_custom_call.1
= control target key start
LH: loop header
LB: loop body
LE: loop exit
PB: predicated region body
PF: predicated region fallthrough
CT: control target
= control target key end

     0   :  { %8 = vsyncpa [#allocation3], 0  ;;  %s631_s0 = inlined_call_operand.hbm [shape: f32[8,16], index: 0, kind: input, shape index: {}]   ;;  %s632_s1 = inlined_call_operand.hbm [shape: bf16[3,128,128], index: 1, kind: input, shape index: {}]   ;;  %s633_s2 = inlined_call_operand.hbm [shape: f32[8,128], index: 2, kind: input, shape index: {}]   ;;  %s634_s3 = inlined_call_operand.hbm [shape: f32[8,8], index: 3, kind: output, shape index: {}]  }
   0x1   :  { %9 = vsyncpa [#allocation6], 0 }
   0x2   :  { %10 = vsyncpa [#allocation4], 0  ;;  %s571_s12 = smov [#allocation5]  }
   0x3   :  { %s26_s13 = sshll.u32 %s571_s12, 4  ;;  %s27_s13 = int_to_ptr.vmem [resolvable:$true] %s26_s13 }
   0x4   :  { %s493_s14 = scalar_lea.vmem %s27_s13, 3072  ;;  %p498_p1 = scmp.lt.s32.totalorder %s27_s13, %s27_s13 }
   0x5   :  { %p494_p0 = scmp.ne.s32.totalorder %s27_s13, %s493_s14  ;;  %p499_p2 = scmp.lt.s32.totalorder %s493_s14, %s493_s14 }
   0x7   :  { %p500_p3 = por %p499_p2, %p498_p1 }
   0x9   :  { %p501_p4 = pnand %p500_p3, %p494_p0 }
   0xb   :  { %504 = shalt.err (!%p501_p4)
}
   0xc   :  { %s572_s15 = smov 64   ;;  %s573_s16 = smov 4  }
   0xd   :  { %32 = dma.hbm_to_vmem [thread:$0]  %s632_s1, 3072, %s27_s13, [#allocation6], %s572_s15, %s572_s15, %s573_s16  }
   0xe   :  { %s574_s19 = smov [#allocation2]   ;;  %s575_s21 = smov [#allocation7]  }
   0xf   :  { %s17_s20 = sshll.u32 %s574_s19, 4  ;;  %s39_s22 = sshll.u32 %s575_s21, 4  ;;  %s18_s20 = int_to_ptr.vmem [resolvable:$true] %s17_s20  ;;  %s40_s22 = int_to_ptr.vmem [resolvable:$true] %s39_s22 }
  0x10   :  { %s513_s23 = scalar_lea.vmem %s18_s20, 128  ;;  %p518_p6 = scmp.lt.s32.totalorder %s18_s20, %s18_s20 }
  0x11   :  { %p514_p5 = scmp.ne.s32.totalorder %s18_s20, %s513_s23  ;;  %p519_p7 = scmp.lt.s32.totalorder %s513_s23, %s513_s23 }
  0x13   :  { %p520_p8 = por %p519_p7, %p518_p6 }
  0x15   :  { %p521_p9 = pnand %p520_p8, %p514_p5 }
  0x17   :  { %524 = shalt.err (!%p521_p9)
}
  0x18   :  { %20 = dma.hbm_to_vmem [thread:$0]  %s631_s0, 128, %s18_s20, [#allocation3]  }
  0x19   :  { %s533_s26 = scalar_lea.vmem %s40_s22, 128  ;;  %p538_p11 = scmp.lt.s32.totalorder %s40_s22, %s40_s22 }
  0x1a   :  { %p534_p10 = scmp.ne.s32.totalorder %s40_s22, %s533_s26  ;;  %p539_p12 = scmp.lt.s32.totalorder %s533_s26, %s533_s26 }
  0x1c   :  { %p540_p13 = por %p539_p12, %p538_p11 }
  0x1e   :  { %p541_p0 = pnand %p540_p13, %p534_p10 }
  0x20   :  { %544 = shalt.err (!%p541_p0)
}
  0x21   :  { %42 = dma.hbm_to_vmem [thread:$0]  %s633_s2, 128, %s40_s22, [#allocation6]  }
  0x22   :  { %565 = dma.done.wait [#allocation3], 128  }
  0x23   :  { %566 = vsyncadd [#allocation3], 4294967168 }
  0x24   :  { %567 = dma.done.wait [#allocation6], 3200  }
  0x25   :  { %568 = vsyncadd [#allocation6], 4294964096  ;;  %v576_v0 = vmov 0.0   ;;  %vm577_vm0 = vmmov 0   ;;  %v466_v1 = vld [vmem:[#allocation5] sm:$0xff]   ;;  %v53_v2 = vld [vmem:[#allocation2] sm:$0xff] }
  0x26   :  { %412 = vmatprep.subr.bf16.mxu0 %v576_v0  ;;  %414 = vmatprep.mubr.msk.bf16.mxu0 %vm577_vm0, %v576_v0  ;;  %v54_v3 = vpack.c.bf16 %v53_v2, %v53_v2  ;;  %vm106_vm1 = vcmask 130048   ;;  %v467_v4 = vld [vmem:[#allocation5 + $0x78] sm:$0xff]   ;;  %v468_v5 = vld [vmem:[#allocation5 + $0x70] sm:$0xff]   ;;  %v469_v6 = vld [vmem:[#allocation5 + $0x68] sm:$0xff]   ;;  %s578_s0 = smov [#allocation8]   ;;  %vm351_vm2 = vcmask 64512  }
  0x27   :  { %418 = vmatprep.subr.bf16.mxu1 %v576_v0  ;;  %434 = vmatprep.mubr.msk.bf16.mxu1 %vm577_vm0, %v576_v0  ;;  %v470_v7 = vld [vmem:[#allocation5 + $0x60] sm:$0xff]   ;;  %v471_v8 = vld [vmem:[#allocation5 + $0x58] sm:$0xff]   ;;  %v472_v9 = vld [vmem:[#allocation5 + $0x50] sm:$0xff]   ;;  %s359_s2 = sshll.u32 %s578_s0, 4  ;;  %s360_s2 = int_to_ptr.vmem [resolvable:$true] %s359_s2 }
  0x28   :  { %413 = vmatpush3.bf16.msra.mxu0 %v466_v1  ;;  %419 = vmatpush3.bf16.msra.mxu1 %v467_v4  ;;  %v473_v10 = vld [vmem:[#allocation5 + $0x48] sm:$0xff]   ;;  %v474_v11 = vld [vmem:[#allocation5 + $0x40] sm:$0xff]   ;;  %v475_v12 = vld [vmem:[#allocation5 + $0xb8] sm:$0xff]   ;;  %s545_s28 = scalar_lea.vmem %s360_s2, 128  ;;  %p550_p2 = scmp.lt.s32.totalorder %s360_s2, %s360_s2 }
  0x29   :  { %438 = vmatprep.subr.bf16.mxu0 %v576_v0  ;;  %420 = vmatprep.subr.bf16.mxu1 %v576_v0  ;;  %v476_v13 = vld [vmem:[#allocation5 + $0xb0] sm:$0xff]   ;;  %v369_v14 = vld [vmem:[#allocation7] ss:$0 sm:$0xff]  ;;  %v477_v22 = vld [vmem:[#allocation5 + $0xa8] sm:$0xff]   ;;  %p546_p1 = scmp.ne.s32.totalorder %s360_s2, %s545_s28  ;;  %p551_p3 = scmp.lt.s32.totalorder %s545_s28, %s545_s28 }
  0x2a   :  { %v478_v23 = vld [vmem:[#allocation5 + $0xa0] sm:$0xff]   ;;  %v479_v24 = vld [vmem:[#allocation5 + $0x98] sm:$0xff]   ;;  %v480_v25 = vld [vmem:[#allocation5 + $0x90] sm:$0xff]  }
  0x2b   :  { %415 = vmatmul.mubr.msk.bf16.vlgmr.msra.gmra.mxu0 %vm106_vm1, %v54_v3  ;;  %v481_v26 = vld [vmem:[#allocation5 + $0x88] sm:$0xff]   ;;  %v482_v27 = vld [vmem:[#allocation5 + $0x80] sm:$0xff]   ;;  %p552_p4 = por %p551_p3, %p550_p2 }
  0x2c   :  { %454 = vmatprep.mubr.msk.bf16.mxu0 %vm577_vm0, %v576_v0  ;;  %421 = vmatpush3.bf16.msra.mxu1 %v468_v5  ;;  %v372_v28 = vld [vmem:[#allocation7 + $0x1] ss:$0 sm:$0xff]  ;;  %v381_v35 = vld [vmem:[#allocation7 + $0x3] ss:$0 sm:$0xff]  ;;  %v382_v36 = vld [vmem:[#allocation7 + $0x4] ss:$0 sm:$0xff] }
  0x2d   :  { %422 = vmatprep.subr.bf16.mxu1 %v576_v0  ;;  %439 = vmatpush3.bf16.msra.mxu0 %v475_v12  ;;  %v391_v42 = vld [vmem:[#allocation7 + $0x2] ss:$0 sm:$0xff]  ;;  %p553_p5 = pnand %p552_p4, %p546_p1 }
  0x2e   :  { %440 = vmatprep.subr.bf16.mxu0 %v576_v0 }
  0x30   :  { %423 = vmatpush3.bf16.msra.mxu1 %v469_v6 }
  0x31   :  { %424 = vmatprep.subr.bf16.mxu1 %v576_v0  ;;  %441 = vmatpush3.bf16.msra.mxu0 %v476_v13 }
  0x32   :  { %442 = vmatprep.subr.bf16.mxu0 %v576_v0 }
  0x34   :  { %425 = vmatpush3.bf16.msra.mxu1 %v470_v7 }
  0x35   :  { %426 = vmatprep.subr.bf16.mxu1 %v576_v0  ;;  %443 = vmatpush3.bf16.msra.mxu0 %v477_v22 }
  0x36   :  { %444 = vmatprep.subr.bf16.mxu0 %v576_v0 }
  0x38   :  { %427 = vmatpush3.bf16.msra.mxu1 %v471_v8 }
  0x39   :  { %428 = vmatprep.subr.bf16.mxu1 %v576_v0  ;;  %445 = vmatpush3.bf16.msra.mxu0 %v478_v23 }
  0x3a   :  { %446 = vmatprep.subr.bf16.mxu0 %v576_v0 }
  0x3c   :  { %429 = vmatpush3.bf16.msra.mxu1 %v472_v9 }
  0x3d   :  { %430 = vmatprep.subr.bf16.mxu1 %v576_v0  ;;  %447 = vmatpush3.bf16.msra.mxu0 %v479_v24 }
  0x3e   :  { %448 = vmatprep.subr.bf16.mxu0 %v576_v0 }
  0x40   :  { %431 = vmatpush3.bf16.msra.mxu1 %v473_v10 }
  0x41   :  { %432 = vmatprep.subr.bf16.mxu1 %v576_v0  ;;  %449 = vmatpush3.bf16.msra.mxu0 %v480_v25 }
  0x42   :  { %450 = vmatprep.subr.bf16.mxu0 %v576_v0 }
  0x44   :  { %433 = vmatpush3.bf16.msra.mxu1 %v474_v11 }
  0x45   :  { %451 = vmatpush3.bf16.msra.mxu0 %v481_v26 }
  0x46   :  { %452 = vmatprep.subr.bf16.mxu0 %v576_v0 }
  0x49   :  { %453 = vmatpush3.bf16.msra.mxu0 %v482_v27 }
  0xeb   :  { %v144_v15 = vpop.f32.mrf.mxu0 }
  0xec   :  { %v145_v16 = vadd.f32 %v369_v14, %v144_v15 }
  0xed   :  { %v416_v17 = vpop.f32.mrf.mxu0 }
  0xee   :  { %v150_v18 = vmax.f32 %v145_v16, 0.0 }
  0xef   :  { %v147_v19 = vpop.f32.mrf.mxu0 }
  0xf0   :  { %v151_v20 = vpack.c.bf16 %v150_v18, %v150_v18 }
  0xf1   :  { %v417_v21 = vpop.f32.mrf.mxu0 }
  0xf2   :  { %435 = vmatmul.mubr.bf16.vlgmr.msra.gmra.mxu1 %v151_v20 }
 0x1b2   :  { %v238_v29 = vpop.f32.mrf.mxu1 }
 0x1b3   :  { %v239_v30 = vadd.f32 %v372_v28, %v238_v29 }
 0x1b4   :  { %v436_v31 = vpop.f32.mrf.mxu1 }
 0x1b5   :  { %483 = vtanh.f32 %v239_v30  ;;  %v250_v34 = vmax.f32 %v239_v30, 0.0 }
 0x1b6   :  { %v241_v32 = vpop.f32.mrf.mxu1 }
 0x1b7   :  { %v255_v39 = vmul.f32 %v382_v36, %v250_v34 }
 0x1b8   :  { %v437_v33 = vpop.f32.mrf.mxu1 }
 0x1c2   :  { %v484_v37 = vpop.eup %483 }
 0x1c3   :  { %v249_v38 = vmul.f32 %v484_v37, %v381_v35 }
 0x1c5   :  { %v256_v40 = vadd.f32 %v255_v39, %v249_v38 }
 0x1c7   :  { %v257_v41 = vpack.c.bf16 %v256_v40, %v256_v40 }
 0x1c9   :  { %455 = vmatmul.mubr.bf16.vlgmr.msra.gmra.mxu0 %v257_v41 }
 0x289   :  { %v340_v43 = vpop.f32.mrf.mxu0 }
 0x28a   :  { %v350_v44 = vadd.f32 %v391_v42, %v340_v43 }
 0x28b   :  { %v456_v45 = vpop.f32.mrf.mxu0 }
 0x28c   :  { %352 = vst.msk [vmem:[#allocation8] sm:$0xff] %vm351_vm2, %v350_v44 }
 0x28d   :  { %v343_v46 = vpop.f32.mrf.mxu0 }
 0x28e   :  { %556 = shalt.err (!%p553_p5)
}
 0x28f   :  { %362 = dma.vmem_to_hbm [thread:$0]  %s360_s2, 128, %s634_s3, [#allocation4]   ;;  %v457_v47 = vpop.f32.mrf.mxu0 }
 0x290   :  { %569 = dma.done.wait [#allocation4], 128  }
 0x291   :  { %570 = vsyncadd [#allocation4], 4294967168 }
 0x292   :  { %366 = vsyncpa [#allocation3], 1 }
 0x293   :  { %367 = vsyncpa [#allocation6], 1 }
 0x294   :  { %368 = vsyncpa [#allocation4], 1 }

</bundles_post_ra>
